<compile_context>
chip_gen: v7x
topology: tpu7x:2x2x1
jax: 0.10.0
libtpu: 0.0.40
codegen_flags: <defaults>
</compile_context>

<pallas_src>
import functools

import jax
import jax.numpy as jnp
import numpy as np
from jax.experimental import pallas as pl
from jax.experimental.pallas import tpu as pltpu


def _decoder_kernel(p_ref, w_ref, b_ref, m_ref, o_ref, *, window,
                    negative_slope):
    """One lane tile of the flattened (batch*spatial) axis per grid step.

    p_ref : (K, T)     bf16  im2col patches of (img*mask)
    w_ref : (Cout, K)  bf16  BN-folded conv weight
    b_ref : (Cout, 1)  f32   BN-folded bias
    m_ref : (1, T)     f32   mask-window sum (precomputed conv(mask, ones))
    o_ref : (Cout, T)  f32   img output (post BN + LeakyReLU), lane-dense
    """
    # Single lane-dense MXU matmul, f32 accumulation.
    acc = jnp.dot(w_ref[...], p_ref[...], preferred_element_type=jnp.float32)

    msum = m_ref[...]                                   # (1, T) exact f32
    # Keras PConv normalisation; the approx reciprocal runs on the EUP slot.
    # clip() zeroes fully-masked windows and the zero-padded lane columns.
    factor = (window * pl.reciprocal(msum + 1e-8, approx=True)
              ) * jnp.clip(msum, 0.0, 1.0)

    out = acc * factor + b_ref[...]                     # bias + BN folded
    o_ref[...] = jnp.where(out >= 0, out, negative_slope * out)   # LeakyReLU


def decoder_layer_forward(img_in, mask_in, e_conv, e_mask, params, *,
                          kernel_size, negative_slope=0.4, bn_eps=1e-5,
                          max_lane_tile=2048):
    """Inputs/outputs in PyTorch NCHW layout."""
    def up2(t):  # nearest-neighbour upsample x2 (NCHW)
        return jnp.repeat(jnp.repeat(t, 2, axis=2), 2, axis=3)

    ci = jnp.concatenate([e_conv, up2(img_in)], axis=1).astype(jnp.float32)
    cm = jnp.concatenate([e_mask, up2(mask_in)], axis=1).astype(jnp.float32)
    x = ci * cm                                          # masked image

    B, Cin, Hin, Win = x.shape
    kh = kw = kernel_size
    Hout, Wout = Hin - kh + 1, Win - kw + 1
    HW = Hout * Wout
    K = kh * kw * Cin
    total = B * HW

    # im2col of the masked image only; rows ordered (tap, channel).
    cols = [x[:, :, di:di + Hout, dj:dj + Wout]
            for di in range(kh) for dj in range(kw)]     # each (B, Cin, Ho, Wo)
    patches = jnp.stack(cols, axis=1).reshape(B, K, HW)
    patches = jnp.transpose(patches, (1, 0, 2)).reshape(K, total)  # batch->lanes

    # Mask-window sum = conv(cm, ones): exact f32 adds (no MXU), wrapper-side.
    cm_sum = jnp.sum(cm, axis=1, keepdims=True)          # (B, 1, Hin, Win)
    msum = jax.lax.reduce_window(cm_sum, 0.0, jax.lax.add,
                                 window_dimensions=(1, 1, kh, kw),
                                 window_strides=(1, 1, 1, 1),
                                 padding="VALID")        # (B, 1, Hout, Wout)
    msum_flat = jnp.transpose(msum.reshape(B, 1, HW), (1, 0, 2)).reshape(1, total)

    # Lane tiling: >= 2 lane-aligned "parallel" tiles (v7x has 2 TensorCores),
    # capped at max_lane_tile to stay comfortably inside v7x's 64 MiB VMEM.
    half = pl.cdiv(pl.cdiv(total, 2), 128) * 128
    lane_tile = max(128, min(max_lane_tile, half))
    grid_l = pl.cdiv(total, lane_tile)
    total_p = grid_l * lane_tile

    patches = jnp.pad(patches, ((0, 0), (0, total_p - total))
                      ).astype(jnp.bfloat16)
    msum_flat = jnp.pad(msum_flat, ((0, 0), (0, total_p - total)))

    # Fold conv bias + inference BatchNorm into the weight / bias.
    W = params["conv_w"].astype(jnp.float32)             # (Cout, Cin, kh, kw)
    Cout = W.shape[0]
    scale = params["bn_gamma"] * jax.lax.rsqrt(params["bn_var"] + bn_eps)
    # OIHW -> (Cout, kh*kw*Cin), column index ordered (tap, channel).
    w2d = jnp.transpose(W * scale[:, None, None, None], (0, 2, 3, 1)
                        ).reshape(Cout, K)
    w_bf16 = w2d.astype(jnp.bfloat16)
    b_fold = ((params["conv_b"] - params["bn_mean"]) * scale
              + params["bn_beta"]).astype(jnp.float32).reshape(Cout, 1)

    kernel = functools.partial(_decoder_kernel, window=float(kh * kw),
                               negative_slope=negative_slope)

    cost = pl.CostEstimate(
        flops=2 * Cout * K * total_p,
        transcendentals=total_p,
        bytes_accessed=(patches.size * 2 + w_bf16.size * 2
                        + msum_flat.size * 4 + b_fold.size * 4
                        + Cout * total_p * 4))

    img2d = pl.pallas_call(
        kernel,
        out_shape=jax.ShapeDtypeStruct((Cout, total_p), jnp.float32),
        grid=(grid_l,),
        in_specs=[
            pl.BlockSpec((K, lane_tile), lambda t: (0, t)),
            pl.BlockSpec((Cout, K), lambda t: (0, 0)),
            pl.BlockSpec((Cout, 1), lambda t: (0, 0)),
            pl.BlockSpec((1, lane_tile), lambda t: (0, t)),
        ],
        out_specs=pl.BlockSpec((Cout, lane_tile), lambda t: (0, t)),
        compiler_params=pltpu.CompilerParams(
            dimension_semantics=("parallel",),
            vmem_limit_bytes=32 * 1024 * 1024),
        cost_estimate=cost,
    )(patches, w_bf16, b_fold, msum_flat)

    img_out = (img2d[:, :total].reshape(Cout, B, Hout, Wout)
               .transpose(1, 0, 2, 3))                   # (B, Cout, Ho, Wo)
    mask_clip = jnp.clip(msum, 0.0, 1.0)                 # exact f32, (B,1,Ho,Wo)
    mask_out = jnp.broadcast_to(mask_clip, (B, Cout, Hout, Wout))
    return img_out, mask_out


def _reference(img_in, mask_in, e_conv, e_mask, params, *, kernel_size,
               negative_slope=0.4, bn_eps=1e-5):
    """Pure-JAX reference of the same semantics (for validation)."""
    up2 = lambda t: jnp.repeat(jnp.repeat(t, 2, axis=2), 2, axis=3)
    ci = jnp.concatenate([e_conv, up2(img_in)], axis=1)
    cm = jnp.concatenate([e_mask, up2(mask_in)], axis=1)
    W = params["conv_w"]

    conv = lambda a, w: jax.lax.conv_general_dilated(
        a, w, (1, 1), "VALID",
        dimension_numbers=("NCHW", "OIHW", "NCHW"),
        precision=jax.lax.Precision.HIGHEST)

    raw = conv(ci * cm, W)
    msum = conv(cm, jnp.ones_like(W))
    ratio = float(kernel_size * kernel_size) / (msum + 1e-8)
    mclip = jnp.clip(msum, 0.0, 1.0)
    out = raw * (ratio * mclip) + params["conv_b"][None, :, None, None]
    inv = 1.0 / jnp.sqrt(params["bn_var"] + bn_eps)
    out = ((out - params["bn_mean"][None, :, None, None])
           * (inv * params["bn_gamma"])[None, :, None, None]
           + params["bn_beta"][None, :, None, None])
    out = jnp.where(out >= 0, out, negative_slope * out)
    return out, mclip


if __name__ == "__main__":
    # DecoderLayer(in_channels=4, out_channels=8, kernel_size=3, bn=True)
    B, Cin_dec, Cout, Ksz = 2, 4, 8, 3
    H = W = 8                      # img_in / mask_in spatial; encoder side is 16x16

    key = jax.random.PRNGKey(0)
    k = jax.random.split(key, 8)

    img_in = jax.random.normal(k[0], (B, Cin_dec, H, W), jnp.float32)
    mask_in = (jax.random.uniform(k[1], (B, Cin_dec, H, W)) > 0.3
               ).astype(jnp.float32)
    e_conv = jax.random.normal(k[2], (B, Cout, 2 * H, 2 * W), jnp.float32)
    e_mask = (jax.random.uniform(k[3], (B, Cout, 2 * H, 2 * W)) > 0.3
              ).astype(jnp.float32)

    Cin_total = Cin_dec + Cout
    params = {
        "conv_w": 0.1 * jax.random.normal(k[4], (Cout, Cin_total, Ksz, Ksz),
                                          jnp.float32),
        "conv_b": 0.1 * jax.random.normal(k[5], (Cout,), jnp.float32),
        "bn_gamma": jnp.ones((Cout,), jnp.float32)
                    + 0.1 * jax.random.normal(k[6], (Cout,), jnp.float32),
        "bn_beta": 0.1 * jax.random.normal(k[7], (Cout,), jnp.float32),
        "bn_mean": jnp.zeros((Cout,), jnp.float32),
        "bn_var": jnp.ones((Cout,), jnp.float32),
    }

    img_out, mask_out = decoder_layer_forward(
        img_in, mask_in, e_conv, e_mask, params, kernel_size=Ksz)
    jax.block_until_ready((img_out, mask_out))
    ref_mask_shape = (B, Cout, 2 * H - Ksz + 1, 2 * W - Ksz + 1)
    assert img_out.shape == ref_mask_shape and mask_out.shape == ref_mask_shape

    ref_img, ref_mclip = _reference(
        img_in, mask_in, e_conv, e_mask, params, kernel_size=Ksz)
    ref_mask = jnp.broadcast_to(ref_mclip, ref_mask_shape)
    # bf16 MXU inputs + approx reciprocal vs HIGHEST-precision f32 reference.
    np.testing.assert_allclose(np.asarray(img_out), np.asarray(ref_img),
                               rtol=5e-2, atol=5e-2)
    # Mask path is exact f32 (computed wrapper-side), so keep a tight check.
    np.testing.assert_allclose(np.asarray(mask_out), np.asarray(ref_mask),
                               rtol=1e-5, atol=1e-5)

    print("KERNEL_OK")
</pallas_src>

<mosaic_0001>
module attributes {stable_mosaic.version = 11 : i64} {
  func.func @_decoder_kernel(%arg0: i32, %arg1: memref<108x256xbf16, #tpu.memory_space<vmem>>, %arg2: memref<8x108xbf16, #tpu.memory_space<vmem>>, %arg3: memref<8x1xf32, #tpu.memory_space<vmem>>, %arg4: memref<1x256xf32, #tpu.memory_space<vmem>>, %arg5: memref<8x256xf32, #tpu.memory_space<vmem>>) attributes {dimension_semantics = [#tpu.dimension_semantics<parallel>], iteration_bounds = array<i64: 2>, scalar_prefetch = 0 : i64, scratch_operands = 0 : i64, tpu.core_type = #tpu.core_type<tc>, window_params = [{transform_indices = @transform_0, window_bounds = array<i64: 108, 256>}, {pipeline_mode = #tpu.pipeline_mode<synchronous>, transform_indices = @transform_1, window_bounds = array<i64: 8, 108>}, {pipeline_mode = #tpu.pipeline_mode<synchronous>, transform_indices = @transform_2, window_bounds = array<i64: 8, 1>}, {transform_indices = @transform_3, window_bounds = array<i64: 1, 256>}, {transform_indices = @transform_4, window_bounds = array<i64: 8, 256>}]} {
    %c0 = arith.constant 0 : index
    %c0_0 = arith.constant 0 : index
    %0 = vector.load %arg2[%c0, %c0_0] : memref<8x108xbf16, #tpu.memory_space<vmem>>, vector<8x108xbf16>
    %c0_1 = arith.constant 0 : index
    %c0_2 = arith.constant 0 : index
    %1 = vector.load %arg1[%c0_1, %c0_2] : memref<108x256xbf16, #tpu.memory_space<vmem>>, vector<108x256xbf16>
    %cst = arith.constant dense<0.000000e+00> : vector<8x256xf32>
    %2 = tpu.matmul %0, %1, %cst {dimension_numbers = #tpu.dot_dimension_numbers<[1], [0], [0], [1], [0, 0, 1, 1], [], []>} : vector<8x108xbf16>, vector<108x256xbf16>, vector<8x256xf32> -> vector<8x256xf32>
    %c0_3 = arith.constant 0 : index
    %c0_4 = arith.constant 0 : index
    %3 = vector.load %arg4[%c0_3, %c0_4] : memref<1x256xf32, #tpu.memory_space<vmem>>, vector<1x256xf32>
    %cst_5 = arith.constant 9.99999993E-9 : f32
    %4 = vector.broadcast %cst_5 : f32 to vector<1x256xf32>
    %5 = arith.addf %3, %4 : vector<1x256xf32>
    %6 = tpu.reciprocal %5 {approx = true} : vector<1x256xf32> -> vector<1x256xf32>
    %cst_6 = arith.constant 9.000000e+00 : f32
    %7 = vector.broadcast %cst_6 : f32 to vector<1x256xf32>
    %8 = arith.mulf %7, %6 : vector<1x256xf32>
    %cst_7 = arith.constant 0.000000e+00 : f32
    %cst_8 = arith.constant 1.000000e+00 : f32
    %9 = vector.broadcast %cst_7 : f32 to vector<1x256xf32>
    %10 = arith.maximumf %9, %3 : vector<1x256xf32>
    %11 = vector.broadcast %cst_8 : f32 to vector<1x256xf32>
    %12 = arith.minimumf %11, %10 : vector<1x256xf32>
    %13 = arith.mulf %8, %12 : vector<1x256xf32>
    %14 = vector.broadcast %13 : vector<1x256xf32> to vector<8x256xf32>
    %15 = arith.mulf %2, %14 : vector<8x256xf32>
    %c0_9 = arith.constant 0 : index
    %c0_10 = arith.constant 0 : index
    %16 = vector.load %arg3[%c0_9, %c0_10] : memref<8x1xf32, #tpu.memory_space<vmem>>, vector<8x1xf32>
    %17 = vector.broadcast %16 : vector<8x1xf32> to vector<8x256xf32>
    %18 = arith.addf %15, %17 : vector<8x256xf32>
    %cst_11 = arith.constant 0.000000e+00 : f32
    %19 = vector.broadcast %cst_11 : f32 to vector<8x256xf32>
    %20 = arith.cmpf oge, %18, %19 : vector<8x256xf32>
    %cst_12 = arith.constant 4.000000e-01 : f32
    %21 = vector.broadcast %cst_12 : f32 to vector<8x256xf32>
    %22 = arith.mulf %21, %18 : vector<8x256xf32>
    %23 = arith.select %20, %18, %22 : vector<8x256xi1>, vector<8x256xf32>
    %c0_13 = arith.constant 0 : index
    %c0_14 = arith.constant 0 : index
    %24 = vector.load %arg5[%c0_13, %c0_14] : memref<8x256xf32, #tpu.memory_space<vmem>>, vector<8x256xf32>
    tpu.vector_store %arg5[%c0_13, %c0_14], %23 {strides = array<i32>} : memref<8x256xf32, #tpu.memory_space<vmem>>, vector<8x256xf32>,
    return
  }
  func.func @transform_0(%arg0: i32) -> (i32, i32) {
    %c0_i32 = arith.constant 0 : i32
    %c0_i32_0 = arith.constant 0 : i32
    return %c0_i32, %arg0 : i32, i32
  }
  func.func @transform_1(%arg0: i32) -> (i32, i32) {
    %c0_i32 = arith.constant 0 : i32
    %c0_i32_0 = arith.constant 0 : i32
    %c0_i32_1 = arith.constant 0 : i32
    return %c0_i32, %c0_i32_0 : i32, i32
  }
  func.func @transform_2(%arg0: i32) -> (i32, i32) {
    %c0_i32 = arith.constant 0 : i32
    %c0_i32_0 = arith.constant 0 : i32
    %c0_i32_1 = arith.constant 0 : i32
    return %c0_i32, %c0_i32_0 : i32, i32
  }
  func.func @transform_3(%arg0: i32) -> (i32, i32) {
    %c0_i32 = arith.constant 0 : i32
    %c0_i32_0 = arith.constant 0 : i32
    return %c0_i32, %arg0 : i32, i32
  }
  func.func @transform_4(%arg0: i32) -> (i32, i32) {
    %c0_i32 = arith.constant 0 : i32
    %c0_i32_0 = arith.constant 0 : i32
    return %c0_i32, %arg0 : i32, i32
  }
}

</mosaic_0001>

<bundles_post_ra>
// kernel: tpu_custom_call.1
= control target key start
LH: loop header
LB: loop body
LE: loop exit
PB: predicated region body
PF: predicated region fallthrough
CT: control target
= control target key end

     0   :  { %9 = vsyncpa [#allocation3], 0  ;;  %s922_s0 = inlined_call_operand.hbm [shape: bf16[108,512], index: 0, kind: input, shape index: {}]   ;;  %s923_s1 = inlined_call_operand.vmem [shape: bf16[8,108], index: 1, kind: input, shape index: {}]   ;;  %s924_s2 = inlined_call_operand.vmem [shape: f32[8,1], index: 2, kind: input, shape index: {}]   ;;  %s925_s3 = inlined_call_operand.vmem [shape: f32[1,512], index: 3, kind: input, shape index: {}]   ;;  %s926_s4 = inlined_call_operand.hbm [shape: f32[8,512], index: 4, kind: output, shape index: {}]  }
   0x1   :  { %11 = vsyncpa [#allocation3 + $0x1], 0 }
   0x2   :  { %12 = vsyncpa [#allocation4], 0 }
   0x3   :  { %14 = vsyncpa [#allocation4 + $0x1], 0  ;;  %s739_s15 = smov 0   ;;  %s741_s16 = smov 0  }
   0x4   :  { %s743_s17 = smov 0   ;;  %s745_s18 = smov 0  }
   0x5 LB: > { %s760_s19 = sadd.s32 4294967295, %s706_s18   ;;  %s503_s20 = sadd.s32 4294967294, %s706_s18   ;;  %s706_s18 = sphi %s745_s18, %s939_s18   ;;  %s702_s17 = sphi %s743_s17, %s938_s17   ;;  %s698_s16 = sphi %s741_s16, %s937_s16   ;;  %s694_s15 = sphi %s739_s15, %s936_s15  }
   0x6   : > { %s764_s21 = sadd.s32 1, %s706_s18   ;;  %s27_s22 = sadd.s32 1, %s702_s17 }
   0x7   : > { %s24_s23 = ssub.s32 %s706_s18, %s764_s21  ;;  %p34_p0 = scmp.ne.s32.totalorder %s702_s17, %s698_s16 }
   0x8   : > { %p25_p1 = scmp.eq.s32.totalorder %s24_s23, 0  ;;  %p35_p2 = scmp.eq.s32.totalorder %s706_s18, 0 }
   0x9   : > { %p40_p3 = scmp.ne.s32.totalorder %s698_s16, %s694_s15  ;;  %p41_p4 = scmp.eq.s32.totalorder %s760_s19, 0 }
   0xa   : > { %s776_s24 = scalar_select %p25_p1, %s702_s17, %s27_s22  }
   0xb   : > { %p36_p5 = por %p35_p2, %p34_p0  ;;  %p778_p6 = por %p41_p4, %p40_p3 }
   0xc   : > { %p132_p7 = scmp.eq.s32.totalorder %s760_s19, 1  ;;  %p138_p8 = scmp.eq.s32.totalorder %s503_s20, 1 }
   0xd   : > { %p548_p10 = scmp.lt.s32.totalorder %s706_s18, 2  ;;  %s164_s28 = sand.u32 1, %s702_s17  }
   0xe   : > { %p785_p11 = por %p132_p7, %p34_p0  ;;  %p789_p12 = por %p138_p8, %p40_p3 }
   0xf   : > { %s532_s29 = sshll.u32 %s706_s18, 7  ;;  %s534_s30 = smul.u32 112, %s164_s28 }
  0x10   : > { %s929_s26 = scalar_select %p785_p11, 1, 0 }
  0x11   : > { %s930_s27 = scalar_select %p789_p12, 1, 0 }
  0x12   : > { %s798_s7 = scalar_lea.hbm %s922_s0, %s532_s29  ;;  %p800_p13 = pnand %p548_p10, %p36_p5 }
  0x13   : > { %s168_s9 = scalar_lea.vmem [#allocation2], %s534_s30  ;;  %s807_s11 = scalar_lea.sflag [#allocation3], %s164_s28 }
  0x14   : > { %s175_s10 = sshll.u32 %s168_s9, 4  ;;  %s610_s12 = scalar_lea.hbm %s798_s7, 1792  ;;  %s804_s10 = int_to_ptr.vmem [resolvable:$true] %s175_s10 }
  0x15   : > { %p611_p1 = scmp.ne.s32.totalorder %s798_s7, %s610_s12  ;;  %p612_p2 = pneg %p800_p13 }
  0x16   : > { %s615_s20 = scalar_lea.hbm %s922_s0, 3584  ;;  %p616_p5 = scmp.lt.u32.totalorder %s798_s7, %s922_s0 }
  0x17   : > { %p613_p3 = pnand %p612_p2, %p611_p1  ;;  %p617_p7 = scmp.lt.u32.totalorder %s615_s20, %s610_s12 }
  0x18   : > { %p619_p10 = scmp.lt.u32.totalorder %s610_s12, %s798_s7 }
  0x19   : > { %p614_p4 = pneg %p613_p3  ;;  %p618_p8 = por %p617_p7, %p616_p5 }
  0x1b   : > { %p620_p9 = por %p619_p10, %p618_p8 }
  0x1d   : > { %p621_p0 = pnand %p620_p9, %p614_p4 }
  0x1f   : > { %624 = shalt.err (!%p621_p0)
}
  0x20   : > { %s625_s28 = scalar_lea.vmem %s804_s10, 1792  ;;  %s708_s29 = smov [#allocation2]  }
  0x21   : > { %p626_p1 = scmp.ne.s32.totalorder %s804_s10, %s625_s28  ;;  %s630_s30 = sshll.u32 %s708_s29, 4  ;;  %s631_s30 = int_to_ptr.vmem [resolvable:$false] %s630_s30 }
  0x22   : > { %s632_s5 = scalar_lea.vmem %s631_s30, 3584  ;;  %p633_p11 = scmp.lt.s32.totalorder %s804_s10, %s631_s30 }
  0x23   : > { %p628_p3 = pnand %p626_p1, %p612_p2  ;;  %p634_p5 = scmp.lt.s32.totalorder %s632_s5, %s625_s28 }
  0x25   : > { %p629_p12 = pneg %p628_p3  ;;  %p635_p7 = por %p634_p5, %p633_p11 }
  0x27   : > { %p636_p8 = pnand %p635_p7, %p629_p12 }
  0x29   : > { %639 = shalt.err (!%p636_p8)
}
  0x2a   : > { %s709_s6 = smov 256   ;;  %s710_s9 = smov 128  }
  0x2b   : > { %s711_s12 = smov 8   ;;  %p191_p9 = scmp.lt.s32.totalorder %s706_s18, 3 }
  0x2c   : > { %543 = dma.hbm_to_vmem [thread:$0]  (!%p800_p13), %s798_s7, 1792, %s804_s10, %s807_s11, %s709_s6, %s710_s9, %s711_s12  }
  0x2d   : > { %p932_p0 = scmp.ge.s32.totalorder %s706_s18, 1 }
  0x2f   : > { %p192_p2 = pnand %p932_p0, %p191_p9 }
  0x30   : > { %s839_s13 = sand.u32 (!%p192_p2), 1, %s698_s16  }
  0x31   : > { %195 = sbr.rel (%p192_p2) target bundleno = 321 (0x141), region = 36  ;;  %s198_s20 = scalar_lea.sflag (!%p192_p2), [#allocation3], %s839_s13 }
  0x32   : > { %s535_s14 = smul.u32 (!%p192_p2), 112, %s839_s13 }
  0x34   : > { %s843_s22 = scalar_lea.vmem (!%p192_p2), [#allocation2], %s535_s14 }
  0x38   : > { %685 = dma.done.wait (%p778_p6), %s198_s20, 1792  }
  0x39   : > { %687 = vsyncadd (%p778_p6), %s198_s20, 4294965504  ;;  %v712_v0 = vmov 0   ;;  %v587_v1 = vld [vmem:[%s843_s22 + $0x4] ss:$8 sps:$4 sm:$0xff]   ;;  %v589_v2 = vld [vmem:[%s843_s22] ss:$8 sps:$4 sm:$0xff]   ;;  %v381_v21 = vlaneseq }
  0x3a   : > { %364 = vmatprep.mubr.bf16.mxu0 %v712_v0  ;;  %586 = vset.pattern.permute.xlu0 %v712_v0  ;;  %v590_v3 = vld [vmem:[%s843_s22 + $0x14] ss:$8 sps:$4 sm:$0xff]   ;;  %v592_v4 = vld [vmem:[%s843_s22 + $0x10] ss:$8 sps:$4 sm:$0xff]   ;;  %v593_v5 = vld [vmem:[%s843_s22 + $0x24] ss:$8 sps:$4 sm:$0xff]  }
  0x3b   : > { %332 = vmatprep.subr.bf16.mxu0 %v587_v1  ;;  %v595_v6 = vld [vmem:[%s843_s22 + $0x20] ss:$8 sps:$4 sm:$0xff]   ;;  %v596_v7 = vld [vmem:[%s843_s22 + $0x34] ss:$8 sps:$4 sm:$0xff]   ;;  %v598_v9 = vld [vmem:[%s843_s22 + $0x30] ss:$8 sps:$4 sm:$0xff]  }
  0x3c   : > { %333 = vmatpush1.bf16.msra.mxu0 %v589_v2  ;;  %v393_v8 = vld [vmem:[%s924_s2] sm:$0xff]  ;;  %vm325_vm0 = vcmask 1045504   ;;  %vm321_vm1 = vcmask 883712   ;;  %s510_s11 = sshll.u32 %s760_s19, 1  ;;  %v382_v25 = vshrl.u32 %v381_v21, 7  ;;  %s509_s30 = sshll.u32 %s839_s13, 4 }
  0x3d   : > { %334 = vmatprep.subr.bf16.mxu0 %v590_v3  ;;  %396 = vperm.xlu0 %586, %v393_v8   ;;  %v599_v10 = vld [vmem:[%s843_s22 + $0x44] ss:$8 sps:$4 sm:$0xff]   ;;  %v601_v11 = vld [vmem:[%s843_s22 + $0x40] ss:$8 sps:$4 sm:$0xff]   ;;  %v602_v12 = vld [vmem:[%s843_s22 + $0x54] ss:$8 sps:$4 sm:$0xff]  }
  0x3e   : > { %v604_v13 = vld [vmem:[%s843_s22 + $0x50] ss:$8 sps:$4 sm:$0xff]   ;;  %v605_v14 = vld [vmem:[%s843_s22 + $0x64] ss:$8 sps:$4 sm:$0x3f]   ;;  %p232_p6 = scmp.lt.s32.totalorder %s510_s11, 3 }
  0x3f   : > { %v607_v15 = vld [vmem:[%s843_s22 + $0x60] ss:$8 sps:$4 sm:$0x3f]   ;;  %v383_v27 = vsub.s32 0, %v382_v25  ;;  %v387_v28 = vsub.s32 1, %v382_v25  ;;  %s533_s5 = sshll.u32 %s760_s19, 8 }
  0x40   : > { %335 = vmatpush1.bf16.msra.mxu0 %v592_v4  ;;  %v327_v16 = vsel %vm325_vm0, %v607_v15, 0  ;;  %v238_v17 = vld [vmem:[%s923_s1] sm:$0xf]  ;;  %s941_s11 = smov (!%p232_p6, %s510_s11), 3  ;;  %s229_s6 = scalar_lea.vmem [#allocation5], %s509_s30 }
  0x41   : > { %336 = vmatprep.subr.bf16.mxu0 %v593_v5  ;;  %s234_s29 = scalar_lea.vmem %s925_s3, %s941_s11  ;;  %s424_s9 = sshll.u32 %s229_s6, 4  ;;  %s880_s9 = int_to_ptr.vmem [resolvable:$true] %s424_s9 }
  0x42   : > { %v373_v18 = vld [vmem:[%s234_s29] sm:$0x3]  ;;  %s878_s20 = scalar_lea.hbm %s926_s4, %s533_s5  ;;  %s410_s19 = scalar_lea.sflag [#allocation4], %s839_s13 }
  0x43   : > { %v374_v19 = vadd.f32 1e-08, %v373_v18  ;;  %v377_v20 = vmax.f32 %v373_v18, 0.0  ;;  %s640_s22 = scalar_lea.vmem %s880_s9, 256  ;;  %p933_p12 = scmp.ne.s32.totalorder %s929_s26, 0 }
  0x44   : > { %337 = vmatpush1.bf16.msra.mxu0 %v595_v6  ;;  %p641_p11 = scmp.ne.s32.totalorder %s880_s9, %s640_s22  ;;  %s713_s25 = smov [#allocation5]  }
  0x45   : > { %338 = vmatprep.subr.bf16.mxu0 %v596_v7  ;;  %608 = vrcp.f32 %v374_v19  ;;  %v378_v24 = vmin.f32 %v377_v20, 1.0  ;;  %s644_s7 = sshll.u32 %s713_s25, 4  ;;  %s645_s7 = int_to_ptr.vmem [resolvable:$false] %s644_s7 }
  0x46   : > { %p642_p13 = pnand %p641_p11, %p933_p12  ;;  %s646_s8 = scalar_lea.vmem %s645_s7, 512 }
  0x47   : > { %p647_p10 = scmp.lt.s32.totalorder %s880_s9, %s645_s7  ;;  %p648_p1 = scmp.lt.s32.totalorder %s646_s8, %s640_s22 }
  0x48   : > { %339 = vmatpush1.bf16.msra.mxu0 %v598_v9  ;;  %p643_p4 = pneg %p642_p13 }
  0x49   : > { %340 = vmatprep.subr.bf16.mxu0 %v599_v10  ;;  %p649_p3 = por %p648_p1, %p647_p10 }
  0x4b   : > { %p650_p5 = pnand %p649_p3, %p643_p4 }
  0x4c   : > { %341 = vmatpush1.bf16.msra.mxu0 %v601_v11 }
  0x4d   : > { %342 = vmatprep.subr.bf16.mxu0 %v602_v12 }
  0x4f   : > { %v609_v22 = vpop.eup %608 }
  0x50   : > { %343 = vmatpush1.bf16.msra.mxu0 %v604_v13  ;;  %v376_v23 = vmul.f32 9.0, %v609_v22 }
  0x51   : > { %525 = vmatprep.subr.msk.bf16.mxu0 %vm325_vm0, %v605_v14 }
  0x52   : > { %v379_v26 = vmul.f32 %v378_v24, %v376_v23 }
  0x54   : > { %345 = vmatpush1.bf16.msra.mxu0 %v327_v16  ;;  %v384_v29 = vrot.slane %v379_v26, %v383_v27  ;;  %v388_v30 = vrot.slane %v379_v26, %v387_v28 }
  0x57   : > { %526 = vmatmul.mubr.msk.bf16.vlgmr.msra.gmra.mrb[0].mxu0 %vm321_vm1, %v238_v17 }
  0xbc   : > { %v397_v32 = vpop.permute.xlu0 %396 }
 0x12a   : > { %v366_v31 = vpop.f32.mrb[0].mxu0 }
 0x12b   : > { %v391_v33 = vmul.f32 %v384_v29, %v366_v31  ;;  %v368_v34 = vpop.f32.mrb[1].mxu0 }
 0x12c   : > { %v392_v35 = vmul.f32 %v388_v30, %v368_v34  ;;  %v370_v36 = vpop.f32.mrb[2].mxu0 }
 0x12d   : > { %v399_v37 = vadd.f32 %v397_v32, %v391_v33  ;;  %v371_v38 = vpop.f32.mrb[3].mxu0 }
 0x12e   : > { %v400_v39 = vadd.f32 %v397_v32, %v392_v35 }
 0x12f   : > { %vm401_vm2 = vcmp.ge.f32.partialorder %v399_v37, 0.0  ;;  %v403_v40 = vmul.f32 0.4, %v399_v37 }
 0x130   : > { %vm402_vm3 = vcmp.ge.f32.partialorder %v400_v39, 0.0  ;;  %v404_v41 = vmul.f32 0.4, %v400_v39 }
 0x131   : > { %v405_v42 = vsel %vm401_vm2, %v399_v37, %v403_v40 }
 0x132   : > { %v406_v43 = vsel %vm402_vm3, %v400_v39, %v404_v41  ;;  %407 = vst [vmem:[%s229_s6] sm:$0xff] %v405_v42 }
 0x133   : > { %408 = vst [vmem:[%s229_s6 + $0x8] sm:$0xff] %v406_v43 }
 0x134   : > { %653 = shalt.err (!%p650_p5)
}
 0x135   : > { %s654_s13 = scalar_lea.hbm %s878_s20, 256  ;;  %s658_s23 = scalar_lea.hbm %s926_s4, 512 }
 0x136   : > { %p655_p7 = scmp.ne.s32.totalorder %s878_s20, %s654_s13  ;;  %p659_p0 = scmp.lt.u32.totalorder %s878_s20, %s926_s4 }
 0x137   : > { %p660_p2 = scmp.lt.u32.totalorder %s658_s23, %s654_s13  ;;  %p662_p11 = scmp.lt.u32.totalorder %s654_s13, %s878_s20 }
 0x138   : > { %p656_p8 = pnand %p655_p7, %p933_p12 }
 0x139   : > { %p661_p6 = por %p660_p2, %p659_p0 }
 0x13a   : > { %p657_p9 = pneg %p656_p8 }
 0x13b   : > { %p663_p13 = por %p662_p11, %p661_p6 }
 0x13d   : > { %p664_p4 = pnand %p663_p13, %p657_p9 }
 0x13f   : > { %667 = shalt.err (!%p664_p4)
}
 0x140   : > { %538 = dma.vmem_to_hbm [thread:$0]  (%p933_p12), %s880_s9, 256, %s878_s20, %s410_s19  }
 0x141 PF: > { %s436_s30 = sand.u32 1, %s694_s15   ;;  %p934_p10 = scmp.ne.s32.totalorder %s930_s27, 0 }
 0x142   : > { %p935_p1 = scmp.ge.s32.totalorder %s706_s18, 2  ;;  %s437_s5 = scalar_lea.sflag [#allocation4], %s436_s30 }
 0x144   : > { %p545_p3 = pnand %p935_p1, %p934_p10 }
 0x146   : > { %689 = dma.done.wait (!%p545_p3), %s437_s5, 256  }
 0x147   : > { %691 = vsyncadd (!%p545_p3), %s437_s5, 4294967040  ;;  %p17_p5 = scmp.ge.s32.totalorder %s764_s21, 4   ;;  %s936_s15 = smov %s698_s16 }
 0x148   : > { %s937_s16 = smov %s702_s17  ;;  %s938_s17 = smov %s776_s24 }
 0x149   : > { %s939_s18 = smov %s764_s21  ;;  %19 = sbr.rel (!%p17_p5) target bundleno = 5 (0x5), region = 84 }
 0x150   :  { %442 = vsyncpa [#allocation3], 1 }
 0x151   :  { %444 = vsyncpa [#allocation3 + $0x1], 1 }
 0x152   :  { %445 = vsyncpa [#allocation4], 1 }
 0x153   :  { %447 = vsyncpa [#allocation4 + $0x1], 1 }

</bundles_post_ra>
